<compile_context>
chip_gen: v5e
topology: v5e:2x2
jax: 0.10.0
libtpu: 0.0.40
codegen_flags: <defaults>
</compile_context>

<pallas_src>
import jax
import jax.numpy as jnp
from jax import lax
from jax.experimental import pallas as pl
from jax.experimental.pallas import tpu as pltpu


def _round_up(x, m):
    return (x + m - 1) // m * m


# ---------------------------------------------------------------------------
# Power specialization (d >= 0 elementwise).
# ---------------------------------------------------------------------------
def _apply_power(d, power_static, p_scalar):
    if power_static is not None:
        p = float(power_static)
        if p == 1.0:
            return d
        if p == 2.0:
            return d * d
        if p == float(int(p)) and 2.0 < p <= 8.0:
            r = d * d
            for _ in range(int(p) - 2):
                r = r * d
            return r
        # Non-integer static power: EUP exp/log; the max() guard keeps log
        # finite at d == 0 (contribution underflows to ~0 for p > 0).
        # TODO(synk): p <= 0 edge cases (0**0, 0**-p) follow exp/log semantics,
        # not torch.pow exactly.
        return jnp.exp(jnp.float32(p) * jnp.log(jnp.maximum(d, jnp.float32(1e-30))))
    # Dynamic (traced) power from SMEM.
    return jnp.exp(p_scalar * jnp.log(jnp.maximum(d, jnp.float32(1e-30))))


# ---------------------------------------------------------------------------
# Kernel factory: per-tile partial sums of (sqrt((x-t)^2+1)-1) ** power
# ---------------------------------------------------------------------------
def _build_kernel(power_static, tr, lw, grid, tail_valid):
    """tail_valid: number of valid flat elements in the LAST grid block
    (== tr*lw when every block is full -> no masking anywhere)."""
    needs_mask = tail_valid != tr * lw

    def _masked_sum(val):
        rid = lax.broadcasted_iota(jnp.int32, val.shape, 0)
        lid = lax.broadcasted_iota(jnp.int32, val.shape, 1)
        flat = rid * lw + lid
        return jnp.sum(jnp.where(flat < tail_valid, val, 0.0), axis=0)

    def _body(p_scalar, x_ref, t_ref, o_ref):
        # Widen after the load: HBM traffic stays in the native input dtype.
        x = x_ref[...].astype(jnp.float32)
        t = t_ref[...].astype(jnp.float32)
        y = x - t
        y2 = y * y
        # Cancellation-free form of sqrt(y^2+1) - 1.
        d = y2 / (jnp.sqrt(y2 + 1.0) + 1.0)
        val = _apply_power(d, power_static, p_scalar)

        if not needs_mask:
            o_ref[0, 0, :] = jnp.sum(val, axis=0)
        elif grid == 1:
            o_ref[0, 0, :] = _masked_sum(val)
        else:
            i = pl.program_id(0)

            @pl.when(i < grid - 1)
            def _():
                o_ref[0, 0, :] = jnp.sum(val, axis=0)

            @pl.when(i == grid - 1)
            def _():
                o_ref[0, 0, :] = _masked_sum(val)

    if power_static is not None:
        def kernel(x_ref, t_ref, o_ref):
            _body(None, x_ref, t_ref, o_ref)
    else:
        def kernel(p_ref, x_ref, t_ref, o_ref):
            _body(p_ref[0, 0], x_ref, t_ref, o_ref)
    return kernel


# ---------------------------------------------------------------------------
# Wrapper: LpowLoss.forward(output, target, power)
# ---------------------------------------------------------------------------
def lpow_loss(output, target, power=2.0, *, lane_width=512, row_tile=1024):
    """Tensor branch of LpowLossFunc: mean of (sqrt((x-t)^2+1)-1) ** power.

    `power` may be a Python float (specialized at trace time; use
    static_argnums under jit) or a traced scalar (SMEM exp/log path).
    row_tile=1024 is safe on v5e/v6e/v7x; raise to 2048 on v6e/v7x for ~3-5%
    more HBM-roofline efficiency on large inputs.
    """
    assert output.shape == target.shape
    n = output.size
    x = output.reshape(-1)            # layout-preserving; no copy, no dtype cast
    t = target.reshape(-1)

    # Pick a lane width that divides n when possible so no host-side pad is
    # needed at all; otherwise pad by < 128 elements (masked in-kernel).
    lw = lane_width
    if n % lw:
        for cand in (512, 256, 128):
            if cand <= lane_width and n % cand == 0:
                lw = cand
                break
        else:
            lw = 128
    if n % lw:
        pad = _round_up(n, lw) - n
        x = jnp.pad(x, (0, pad))
        t = jnp.pad(t, (0, pad))
    rows = x.size // lw
    x = x.reshape(rows, lw)
    t = t.reshape(rows, lw)

    # Tile rows: big lane-dense blocks; keep grid >= 2 when there is enough
    # data so the "parallel" axis shards across both v7x TensorCores.
    if rows <= 16:
        tr = rows                                   # full extent -> any size ok
    elif rows <= row_tile:
        tr = _round_up(pl.cdiv(rows, 2), 8)
    else:
        tr = _round_up(row_tile, 8)
    grid = pl.cdiv(rows, tr)
    # Valid flat elements (relative to block start) in the last block; the
    # rest (tiny lane pad + Pallas partial-block garbage rows) is masked.
    tail_valid = n - (grid - 1) * tr * lw

    power_static = power if isinstance(power, (int, float)) else None
    kernel = _build_kernel(power_static, tr, lw, grid, tail_valid)

    data_spec = pl.BlockSpec((tr, lw), lambda i: (i, 0))
    in_specs = [data_spec, data_spec]
    args = (x, t)
    if power_static is None:
        in_specs = [pl.BlockSpec(memory_space=pltpu.MemorySpace.SMEM)] + in_specs
        args = (jnp.asarray(power, jnp.float32).reshape(1, 1), x, t)

    partials = pl.pallas_call(
        kernel,
        out_shape=jax.ShapeDtypeStruct((grid, 1, lw), jnp.float32),
        grid=(grid,),
        in_specs=in_specs,
        out_specs=pl.BlockSpec((1, 1, lw), lambda i: (i, 0, 0)),
        compiler_params=pltpu.CompilerParams(
            dimension_semantics=("parallel",),
            vmem_limit_bytes=32 * 1024 * 1024,
        ),
    )(*args)

    return jnp.sum(partials) / n
    # TODO(synk): the numpy-array branch of LpowLossFunc (|diff|**p mean on
    # host numpy) is a host-side path and is not ported; only the tensor path.


# ---------------------------------------------------------------------------
# Self-test
# ---------------------------------------------------------------------------
def _reference(o, t, p):
    o = o.astype(jnp.float32)
    t = t.astype(jnp.float32)
    d = jnp.sqrt((o - t) ** 2 + 1.0) - 1.0
    return jnp.sum(d ** p) / d.size


if __name__ == "__main__":
    key = jax.random.PRNGKey(0)
    k1, k2, k3, k4 = jax.random.split(key, 4)

    shape = (2, 4, 16, 16)
    out = jax.random.normal(k1, shape, jnp.float32)
    tgt = jax.random.normal(k2, shape, jnp.float32)

    loss_static = jax.jit(lpow_loss, static_argnums=2)   # power baked in (fast paths)
    loss_dynamic = jax.jit(lpow_loss)                    # power traced -> SMEM path

    for p in (2.0, 1.5, 3.0):
        got = loss_static(out, tgt, p)
        jax.block_until_ready(got)
        want = _reference(out, tgt, p)
        assert bool(jnp.isfinite(got)), (p, got)
        assert bool(jnp.allclose(got, want, rtol=1e-4, atol=1e-6)), (p, float(got), float(want))

    # Dynamic (traced) power path.
    got = loss_dynamic(out, tgt, 2.0)
    jax.block_until_ready(got)
    want = _reference(out, tgt, 2.0)
    assert bool(jnp.allclose(got, want, rtol=1e-4, atol=1e-6)), (float(got), float(want))

    # Awkward size: exercises lane-width fallback + in-kernel tail masking.
    shape2 = (3, 5, 7, 11)
    out2 = jax.random.normal(k3, shape2, jnp.float32)
    tgt2 = jax.random.normal(k4, shape2, jnp.float32)
    got = loss_static(out2, tgt2, 2.0)
    jax.block_until_ready(got)
    want = _reference(out2, tgt2, 2.0)
    assert bool(jnp.allclose(got, want, rtol=1e-4, atol=1e-6)), (float(got), float(want))

    print("KERNEL_OK")
</pallas_src>

<mosaic_0001>
module attributes {stable_mosaic.version = 11 : i64} {
  func.func @kernel(%arg0: i32, %arg1: memref<4x512xf32, #tpu.memory_space<vmem>>, %arg2: memref<4x512xf32, #tpu.memory_space<vmem>>, %arg3: memref<1x1x512xf32, #tpu.memory_space<vmem>>) attributes {dimension_semantics = [#tpu.dimension_semantics<parallel>], iteration_bounds = array<i64: 1>, scalar_prefetch = 0 : i64, scratch_operands = 0 : i64, tpu.core_type = #tpu.core_type<tc>, window_params = [{transform_indices = @transform_0, window_bounds = array<i64: 4, 512>}, {transform_indices = @transform_1, window_bounds = array<i64: 4, 512>}, {transform_indices = @transform_2, window_bounds = array<i64: 1, 1, 512>}]} {
    %c0 = arith.constant 0 : index
    %c0_0 = arith.constant 0 : index
    %0 = vector.load %arg1[%c0, %c0_0] : memref<4x512xf32, #tpu.memory_space<vmem>>, vector<4x512xf32>
    %c0_1 = arith.constant 0 : index
    %c0_2 = arith.constant 0 : index
    %1 = vector.load %arg2[%c0_1, %c0_2] : memref<4x512xf32, #tpu.memory_space<vmem>>, vector<4x512xf32>
    %2 = arith.subf %0, %1 : vector<4x512xf32>
    %3 = arith.mulf %2, %2 : vector<4x512xf32>
    %cst = arith.constant 1.000000e+00 : f32
    %4 = vector.broadcast %cst : f32 to vector<4x512xf32>
    %5 = arith.addf %3, %4 : vector<4x512xf32>
    %6 = math.sqrt %5 : vector<4x512xf32>
    %cst_3 = arith.constant 1.000000e+00 : f32
    %7 = vector.broadcast %cst_3 : f32 to vector<4x512xf32>
    %8 = arith.addf %6, %7 : vector<4x512xf32>
    %9 = arith.divf %3, %8 : vector<4x512xf32>
    %10 = arith.mulf %9, %9 : vector<4x512xf32>
    %cst_4 = arith.constant dense<0.000000e+00> : vector<512xf32>
    %11 = vector.multi_reduction <add>, %10, %cst_4 [0] : vector<4x512xf32> to vector<512xf32>
    %c0_5 = arith.constant 0 : index
    %c0_6 = arith.constant 0 : index
    %c0_7 = arith.constant 0 : index
    %12 = vector.load %arg3[%c0_5, %c0_6, %c0_7] : memref<1x1x512xf32, #tpu.memory_space<vmem>>, vector<1x1x512xf32>
    %13 = vector.shape_cast %12 : vector<1x1x512xf32> to vector<512xf32>
    %14 = vector.shape_cast %11 : vector<512xf32> to vector<1x1x512xf32>
    tpu.vector_store %arg3[%c0_5, %c0_6, %c0_7], %14 {strides = array<i32>} : memref<1x1x512xf32, #tpu.memory_space<vmem>>, vector<1x1x512xf32>,
    return
  }
  func.func @transform_0(%arg0: i32) -> (i32, i32) {
    %c0_i32 = arith.constant 0 : i32
    %c0_i32_0 = arith.constant 0 : i32
    return %arg0, %c0_i32 : i32, i32
  }
  func.func @transform_1(%arg0: i32) -> (i32, i32) {
    %c0_i32 = arith.constant 0 : i32
    %c0_i32_0 = arith.constant 0 : i32
    return %arg0, %c0_i32 : i32, i32
  }
  func.func @transform_2(%arg0: i32) -> (i32, i32, i32) {
    %c0_i32 = arith.constant 0 : i32
    %c0_i32_0 = arith.constant 0 : i32
    %c0_i32_1 = arith.constant 0 : i32
    return %arg0, %c0_i32, %c0_i32_0 : i32, i32, i32
  }
}

</mosaic_0001>

<bundles_post_ra>
// kernel: lpow_loss.1
= control target key start
LH: loop header
LB: loop body
LE: loop exit
PB: predicated region body
PF: predicated region fallthrough
CT: control target
= control target key end

     0   :  { %vm92_vm12 = vcmask 1043456   ;;  %vm128_vm13 = vcmask 1040384   ;;  %vm130_vm14 = vcmask 1042434   ;;  %vm132_vm15 = vcmask 1041408   ;;  %s186_s0 = inlined_call_operand.vmem [shape: f32[4,512], index: 0, kind: input, shape index: {}]   ;;  %s187_s1 = inlined_call_operand.vmem [shape: f32[4,512], index: 1, kind: input, shape index: {}]   ;;  %s188_s2 = inlined_call_operand.vmem [shape: f32[1,1,512], index: 2, kind: output, shape index: {}]  }
   0x1   :  { %v11_v0 = vld [vmem:[%s186_s0] sm:$0xff]  ;;  %v12_v2 = vld [vmem:[%s186_s0 + $0x8] sm:$0xff] }
   0x2   :  { %v13_v1 = vld [vmem:[%s187_s1] sm:$0xff]  ;;  %v14_v4 = vld [vmem:[%s187_s1 + $0x8] sm:$0xff] }
   0x3   :  { %v15_v3 = vsub.f32 %v11_v0, %v13_v1  ;;  %v16_v5 = vsub.f32 %v12_v2, %v14_v4 }
   0x5   :  { %v17_v6 = vmul.f32 %v15_v3, %v15_v3  ;;  %v179_v7 = vmul.f32 %v16_v5, %v16_v5 }
   0x7   :  { %v19_v8 = vadd.f32 1.0, %v17_v6  ;;  %v20_v9 = vadd.f32 1.0, %v179_v7 }
   0x9   :  { %144 = vrsqrt.f32 %v19_v8  ;;  %vm28_vm0 = vcmp.eq.f32.partialorder %v19_v8, inf  ;;  %v31_v21 = vand.u32 2147483648, %v19_v8  ;;  %vm30_vm1 = vcmp.eq.f32.partialorder %v19_v8, 0.0 }
   0xa   :  { %146 = vrsqrt.f32 %v20_v9  ;;  %vm40_vm2 = vcmp.eq.f32.partialorder %v20_v9, inf  ;;  %v43_v24 = vand.u32 2147483648, %v20_v9  ;;  %vm42_vm3 = vcmp.eq.f32.partialorder %v20_v9, 0.0 }
   0xf   :  { %v145_v10 = vpop.eup %144 }
  0x10   :  { %v147_v11 = vpop.eup %146  ;;  %v22_v12 = vmul.f32 %v145_v10, %v19_v8 }
  0x11   :  { %v34_v13 = vmul.f32 %v147_v11, %v20_v9 }
  0x12   :  { %v23_v14 = vmul.f32 %v145_v10, %v22_v12 }
  0x13   :  { %v35_v15 = vmul.f32 %v147_v11, %v34_v13 }
  0x14   :  { %v24_v16 = vmul.f32 0.5, %v23_v14 }
  0x15   :  { %v36_v17 = vmul.f32 0.5, %v35_v15 }
  0x16   :  { %v25_v18 = vsub.f32 1.5, %v24_v16 }
  0x17   :  { %v37_v19 = vsub.f32 1.5, %v36_v17 }
  0x18   :  { %v26_v20 = vmul.f32 %v145_v10, %v25_v18 }
  0x19   :  { %v38_v22 = vmul.f32 %v147_v11, %v37_v19 }
  0x1a   :  { %v27_v23 = vmul.f32 %v26_v20, %v19_v8  ;;  %v135_v20 = vlaneseq }
  0x1b   :  { %v39_v25 = vmul.f32 %v38_v22, %v20_v9 }
  0x1c   :  { %v29_v26 = vsel %vm28_vm0, %v19_v8, %v27_v23  ;;  %vm137_vm0 = vcmp.lt.s32.totalorder %v135_v20, 512 }
  0x1d   :  { %v32_v27 = vsel %vm30_vm1, %v31_v21, %v29_v26  ;;  %v41_v28 = vsel %vm40_vm2, %v20_v9, %v39_v25 }
  0x1e   :  { %v45_v29 = vadd.f32 1.0, %v32_v27  ;;  %v44_v30 = vsel %vm42_vm3, %v43_v24, %v41_v28 }
  0x1f   :  { %v46_v31 = vadd.f32 1.0, %v44_v30 }
  0x20   :  { %148 = vrcp.f32 %v45_v29  ;;  %vm52_vm4 = vweird.f32 %v45_v29  ;;  %v58_v35 = vand.u32 2147483648, %v45_v29  ;;  %v56_v38 = vand.u32 2147483647, %v45_v29 }
  0x21   :  { %150 = vrcp.f32 %v46_v31  ;;  %v73_v39 = vand.u32 2147483648, %v46_v31  ;;  %vm67_vm6 = vweird.f32 %v46_v31  ;;  %v71_v41 = vand.u32 2147483647, %v46_v31 }
  0x22   :  { %v59_v43 = vor.u32 1.1754944e-38, %v58_v35  ;;  %vm57_vm9 = vcmp.eq.f32.partialorder %v56_v38, 8.507059e+37 }
  0x23   :  { %v74_v46 = vor.u32 1.1754944e-38, %v73_v39  ;;  %vm72_vm11 = vcmp.eq.f32.partialorder %v71_v41, 8.507059e+37 }
  0x26   :  { %v149_v32 = vpop.eup %148 }
  0x27   :  { %v151_v33 = vpop.eup %150  ;;  %v48_v34 = vmul.f32 %v149_v32, %v45_v29  ;;  %vm53_vm5 = vweird.f32 %v149_v32 }
  0x28   :  { %v63_v36 = vmul.f32 %v151_v33, %v46_v31  ;;  %vm68_vm7 = vweird.f32 %v151_v33  ;;  %vm54_vm8 = vmor %vm52_vm4, %vm53_vm5 }
  0x29   :  { %v49_v37 = vsub.f32 1.0, %v48_v34  ;;  %vm69_vm10 = vmor %vm67_vm6, %vm68_vm7 }
  0x2a   :  { %v64_v40 = vsub.f32 1.0, %v63_v36 }
  0x2b   :  { %v50_v42 = vmul.f32 %v149_v32, %v49_v37 }
  0x2c   :  { %v65_v44 = vmul.f32 %v151_v33, %v64_v40 }
  0x2d   :  { %v51_v45 = vadd.f32 %v149_v32, %v50_v42 }
  0x2e   :  { %v66_v47 = vadd.f32 %v151_v33, %v65_v44 }
  0x2f   :  { %v55_v48 = vsel %vm54_vm8, %v149_v32, %v51_v45 }
  0x30   :  { %v60_v49 = vsel %vm57_vm9, %v59_v43, %v55_v48  ;;  %v70_v50 = vsel %vm69_vm10, %v151_v33, %v66_v47 }
  0x31   :  { %v61_v51 = vmul.f32 %v60_v49, %v17_v6  ;;  %v75_v52 = vsel %vm72_vm11, %v74_v46, %v70_v50 }
  0x32   :  { %v76_v53 = vmul.f32 %v75_v52, %v179_v7 }
  0x33   :  { %v77_v54 = vmul.f32 %v61_v51, %v61_v51 }
  0x34   :  { %v78_v55 = vmul.f32 %v76_v53, %v76_v53 }
  0x35   :  { %81 = vst [vmem:[#allocation1] ss:$2 sm:$0xff] %v77_v54 }
  0x36   :  { %83 = vst [vmem:[#allocation1 + $0x10] ss:$2 sm:$0xff] %v78_v55 }
  0x3c   :  { %v84_v56 = vld.sshfl [vmem:[#allocation1] sm:$0xff pattern:$0x75316420]  ;;  %v85_v57 = vld.sshfl [vmem:[#allocation1 + $0x8] sm:$0xff pattern:$0x75316420] }
  0x3d   :  { %v86_v58 = vld.sshfl [vmem:[#allocation1 + $0x10] sm:$0xff pattern:$0x75316420]  ;;  %v87_v59 = vld.sshfl [vmem:[#allocation1 + $0x18] sm:$0xff pattern:$0x75316420] }
  0x3e   :  { %v93_v60 = vsel %vm92_vm12, %v84_v56, 0.0  ;;  %v100_v61 = vsel %vm92_vm12, %v85_v57, 0.0  ;;  %v107_v62 = vsel %vm92_vm12, %v86_v58, 0.0  ;;  %v114_v63 = vsel %vm92_vm12, %v87_v59, 0.0 }
  0x3f   :  { %v94_v0 = vrot.slane %v93_v60, 4  ;;  %v101_v1 = vrot.slane %v100_v61, 4  ;;  %v108_v2 = vrot.slane %v107_v62, 4  ;;  %v115_v3 = vrot.slane %v114_v63, 4 }
  0x41   :  { %v95_v4 = vadd.f32 %v94_v0, %v93_v60  ;;  %v102_v5 = vadd.f32 %v101_v1, %v100_v61  ;;  %v109_v6 = vadd.f32 %v108_v2, %v107_v62  ;;  %v116_v7 = vadd.f32 %v115_v3, %v114_v63 }
  0x43   :  { %v96_v8 = vrot.slane %v95_v4, 2  ;;  %v103_v9 = vrot.slane %v102_v5, 2  ;;  %v110_v10 = vrot.slane %v109_v6, 2  ;;  %v117_v11 = vrot.slane %v116_v7, 2 }
  0x45   :  { %v97_v12 = vadd.f32 %v96_v8, %v95_v4  ;;  %v104_v13 = vadd.f32 %v103_v9, %v102_v5  ;;  %v111_v14 = vadd.f32 %v110_v10, %v109_v6  ;;  %v118_v15 = vadd.f32 %v117_v11, %v116_v7 }
  0x47   :  { %v98_v16 = vrot.slane %v97_v12, 1  ;;  %v105_v17 = vrot.slane %v104_v13, 1  ;;  %v112_v18 = vrot.slane %v111_v14, 1  ;;  %v119_v19 = vrot.slane %v118_v15, 1 }
  0x49   :  { %v106_v21 = vadd.f32 %v105_v17, %v104_v13  ;;  %v113_v22 = vadd.f32 %v112_v18, %v111_v14  ;;  %v120_v23 = vadd.f32 %v119_v19, %v118_v15  ;;  %v99_v24 = vadd.f32 %v98_v16, %v97_v12 }
  0x4b   :  { %v125_v25 = vrot.slane %v106_v21, 7  ;;  %v126_v26 = vrot.slane %v113_v22, 6  ;;  %v127_v27 = vrot.slane %v120_v23, 5 }
  0x4d   :  { %v129_v28 = vsel %vm128_vm13, %v99_v24, %v125_v25  ;;  %v131_v29 = vsel %vm130_vm14, %v126_v26, %v127_v27 }
  0x4e   :  { %v133_v30 = vsel %vm132_vm15, %v129_v28, %v131_v29 }
  0x4f   :  { %139 = vst.msk [vmem:[%s188_s2] sm:$0xf] %vm137_vm0, %v133_v30 }

</bundles_post_ra>
